<compile_context>
chip_gen: v7x
topology: tpu7x:2x2x1
jax: 0.10.0
libtpu: 0.0.40
codegen_flags: <defaults>
</compile_context>

<pallas_src>
import jax
import jax.numpy as jnp
from jax import lax
from jax.experimental import pallas as pl
from jax.experimental.pallas import tpu as pltpu

BN_EPS = 1e-5


def _round_up(x, m):
    return ((x + m - 1) // m) * m


# ---------------------------------------------------------------------------
# Small-batch fused kernel: whole (padded) batch in one grid step.
# ---------------------------------------------------------------------------
def actor_fused_kernel(invb_ref, x_ref, w1_ref, w2_ref, w3_ref, pk_ref, out_ref):
    h1_dim = w1_ref.shape[1]
    h2_dim = w2_ref.shape[1]
    a_dim = out_ref.shape[1]
    inv_b = invb_ref[0, 0]

    # fc1 (no bias: a pre-BN bias cancels exactly under training-mode BN).
    h1 = jnp.dot(x_ref[...], w1_ref[...], preferred_element_type=jnp.float32)

    # Exact full-batch BatchNorm (biased variance). Zero-padded rows give
    # h1 == 0 exactly, so they do not perturb the sums; 1/B is the true batch.
    s = jnp.sum(h1, axis=0, keepdims=True)
    sq = jnp.sum(h1 * h1, axis=0, keepdims=True)
    mean = s * inv_b
    var = jnp.maximum(sq * inv_b - mean * mean, 0.0)   # clamp f32 cancellation
    scale = pk_ref[0:1, :h1_dim] * lax.rsqrt(var + BN_EPS)   # EUP: ~free
    shift = pk_ref[1:2, :h1_dim] - mean * scale

    a1 = jnp.maximum(h1 * scale + shift, 0.0)
    a2 = jnp.dot(a1, w2_ref[...], preferred_element_type=jnp.float32)
    a2 = jnp.maximum(a2 + pk_ref[2:3, :h2_dim], 0.0)
    # fc3 on the 128-lane-padded w3, but store only the A useful lanes (compact).
    a3 = jnp.dot(a2, w3_ref[...], preferred_element_type=jnp.float32)
    out_ref[...] = jnp.tanh(a3[:, :a_dim] + pk_ref[3:4, :a_dim])


# ---------------------------------------------------------------------------
# Large-batch path, pass 1: BN statistics reduction over batch tiles.
# Emits folded scale/shift = (gamma*rsqrt(var+eps), beta - mean*scale).
# ---------------------------------------------------------------------------
def actor_stats_kernel(invb_ref, x_ref, w1_ref, gb_ref, ss_ref, sum_ref, sq_ref):
    t = pl.program_id(0)

    @pl.when(t == 0)
    def _init():
        sum_ref[...] = jnp.zeros_like(sum_ref)
        sq_ref[...] = jnp.zeros_like(sq_ref)

    h1 = jnp.dot(x_ref[...], w1_ref[...], preferred_element_type=jnp.float32)
    sum_ref[...] = sum_ref[...] + jnp.sum(h1, axis=0, keepdims=True)
    sq_ref[...] = sq_ref[...] + jnp.sum(h1 * h1, axis=0, keepdims=True)

    @pl.when(t == pl.num_programs(0) - 1)
    def _finalize():
        inv_b = invb_ref[0, 0]
        mean = sum_ref[...] * inv_b
        var = jnp.maximum(sq_ref[...] * inv_b - mean * mean, 0.0)
        scale = gb_ref[0:1, :] * lax.rsqrt(var + BN_EPS)
        ss_ref[0:1, :] = scale
        ss_ref[1:2, :] = gb_ref[1:2, :] - mean * scale


# ---------------------------------------------------------------------------
# Large-batch path, pass 2: forward with pre-folded BN; batch grid is parallel.
# ---------------------------------------------------------------------------
def actor_fwd_kernel(x_ref, w1_ref, w2_ref, w3_ref, ss_ref, b_ref, out_ref):
    h2_dim = w2_ref.shape[1]
    a_dim = out_ref.shape[1]

    h1 = jnp.dot(x_ref[...], w1_ref[...], preferred_element_type=jnp.float32)
    a1 = jnp.maximum(h1 * ss_ref[0:1, :] + ss_ref[1:2, :], 0.0)
    a2 = jnp.dot(a1, w2_ref[...], preferred_element_type=jnp.float32)
    a2 = jnp.maximum(a2 + b_ref[0:1, :h2_dim], 0.0)
    a3 = jnp.dot(a2, w3_ref[...], preferred_element_type=jnp.float32)
    out_ref[...] = jnp.tanh(a3[:, :a_dim] + b_ref[1:2, :a_dim])


def actor_forward(state, params, *, tile_b=4096, vmem_limit_bytes=None):
    """state: (B, S) float32; params: dict (see init_actor_params)."""
    B, S = state.shape
    H1 = params["w1"].shape[1]
    H2 = params["w2"].shape[1]
    A = params["w3"].shape[1]
    A_MX = _round_up(A, 128)           # MXU-internal width only; HBM out is A.

    # Runtime scalar 1/B in SMEM -> no recompile when only the true batch size
    # changes (padded shapes equal).
    inv_b = jnp.full((1, 1), 1.0 / B, jnp.float32)

    # Keep the fc3 matmul at a 128-lane width; only lanes [:A] reach HBM.
    w3p = jnp.zeros((H2, A_MX), jnp.float32).at[:, :A].set(params["w3"])

    def mosaic(dims):
        kw = dict(dimension_semantics=dims)
        if vmem_limit_bytes is not None:      # footprint is tiny here; only
            kw["vmem_limit_bytes"] = vmem_limit_bytes  # needed for huge tiles.
        return pltpu.CompilerParams(**kw)

    smem_spec = pl.BlockSpec(memory_space=pltpu.MemorySpace.SMEM)

    if B <= tile_b:
        # ---------------- single-step fused path (common RL case) ------------
        B_pad = _round_up(B, 8)                       # f32 sublane multiple
        x = state
        if B_pad != B:
            x = jnp.zeros((B_pad, S), state.dtype).at[:B].set(state)

        PK_W = max(H1, H2, A)
        pk = jnp.zeros((4, PK_W), jnp.float32)
        pk = pk.at[0, :H1].set(params["gamma"][0])
        pk = pk.at[1, :H1].set(params["beta"][0])
        pk = pk.at[2, :H2].set(params["b2"][0])
        pk = pk.at[3, :A].set(params["b3"][0])

        out = pl.pallas_call(
            actor_fused_kernel,
            out_shape=jax.ShapeDtypeStruct((B_pad, A), jnp.float32),
            grid_spec=pltpu.PrefetchScalarGridSpec(
                num_scalar_prefetch=0,
                grid=(1,),
                in_specs=[
                    smem_spec,                                     # 1/B scalar
                    pl.BlockSpec((B_pad, S), lambda i: (0, 0)),    # activations
                    pl.BlockSpec((S, H1), lambda i: (0, 0)),       # w1
                    pl.BlockSpec((H1, H2), lambda i: (0, 0)),      # w2
                    pl.BlockSpec((H2, A_MX), lambda i: (0, 0)),    # w3 (padded)
                    pl.BlockSpec((4, PK_W), lambda i: (0, 0)),     # packed vecs
                ],
                out_specs=pl.BlockSpec((B_pad, A), lambda i: (0, 0)),
            ),
            compiler_params=mosaic(("arbitrary",)),
        )(inv_b, x, params["w1"], params["w2"], w3p, pk)
        return out[:B]

    # ---------------- large-batch path: stats pass + parallel forward --------
    TB = _round_up(min(tile_b, B), 8)
    B_pad = _round_up(B, TB)
    T = B_pad // TB
    x = state
    if B_pad != B:
        x = jnp.zeros((B_pad, S), state.dtype).at[:B].set(state)

    gb = jnp.concatenate([params["gamma"], params["beta"]], axis=0)   # (2, H1)

    scale_shift = pl.pallas_call(
        actor_stats_kernel,
        out_shape=jax.ShapeDtypeStruct((2, H1), jnp.float32),
        grid_spec=pltpu.PrefetchScalarGridSpec(
            num_scalar_prefetch=0,
            grid=(T,),
            in_specs=[
                smem_spec,                                         # 1/B scalar
                pl.BlockSpec((TB, S), lambda t: (t, 0)),           # x tile
                pl.BlockSpec((S, H1), lambda t: (0, 0)),           # w1 resident
                pl.BlockSpec((2, H1), lambda t: (0, 0)),           # gamma/beta
            ],
            out_specs=pl.BlockSpec((2, H1), lambda t: (0, 0)),
            scratch_shapes=[
                pltpu.VMEM((1, H1), jnp.float32),                  # running sum
                pltpu.VMEM((1, H1), jnp.float32),                  # running sumsq
            ],
        ),
        compiler_params=mosaic(("arbitrary",)),   # sequential reduction
    )(inv_b, x, params["w1"], gb)

    BW = max(H2, A)
    bias = jnp.zeros((2, BW), jnp.float32)
    bias = bias.at[0, :H2].set(params["b2"][0])
    bias = bias.at[1, :A].set(params["b3"][0])

    out = pl.pallas_call(
        actor_fwd_kernel,
        out_shape=jax.ShapeDtypeStruct((B_pad, A), jnp.float32),
        grid_spec=pltpu.PrefetchScalarGridSpec(
            num_scalar_prefetch=0,
            grid=(T,),
            in_specs=[
                pl.BlockSpec((TB, S), lambda t: (t, 0)),           # x tile
                pl.BlockSpec((S, H1), lambda t: (0, 0)),           # w1 resident
                pl.BlockSpec((H1, H2), lambda t: (0, 0)),          # w2 resident
                pl.BlockSpec((H2, A_MX), lambda t: (0, 0)),        # w3 (padded)
                pl.BlockSpec((2, H1), lambda t: (0, 0)),           # scale/shift
                pl.BlockSpec((2, BW), lambda t: (0, 0)),           # b2/b3
            ],
            out_specs=pl.BlockSpec((TB, A), lambda t: (t, 0)),     # compact
        ),
        # Independent batch tiles -> shardable across v7x's two TensorCores.
        compiler_params=mosaic(("parallel",)),
    )(x, params["w1"], params["w2"], w3p, scale_shift, bias)

    return out[:B]


def init_actor_params(key, state_size, action_size, actor_units):
    """Deterministic re-implementation of Actor.__init__ / reset_parameters.

    hidden_init uses weight.size()[0] == out_features (as in the reference),
    so lim = 1/sqrt(out_features) for fc1/fc2 weights.  Biases keep PyTorch's
    default Linear init U(-1/sqrt(fan_in), +1/sqrt(fan_in)).  BN: gamma=1,
    beta=0.  b1 is kept here (and in the pure-JAX reference) to demonstrate
    that dropping it inside the kernel is exact: it cancels under
    training-mode BatchNorm.
    """
    h1, h2 = actor_units
    ks = jax.random.split(key, 6)

    lim1 = 1.0 / jnp.sqrt(jnp.float32(h1))
    lim2 = 1.0 / jnp.sqrt(jnp.float32(h2))

    w1 = jax.random.uniform(ks[0], (state_size, h1), jnp.float32, -lim1, lim1)
    w2 = jax.random.uniform(ks[1], (h1, h2), jnp.float32, -lim2, lim2)
    w3 = jax.random.uniform(ks[2], (h2, action_size), jnp.float32, -3e-3, 3e-3)

    bl1 = 1.0 / jnp.sqrt(jnp.float32(state_size))
    bl2 = 1.0 / jnp.sqrt(jnp.float32(h1))
    bl3 = 1.0 / jnp.sqrt(jnp.float32(h2))
    b1 = jax.random.uniform(ks[3], (1, h1), jnp.float32, -bl1, bl1)
    b2 = jax.random.uniform(ks[4], (1, h2), jnp.float32, -bl2, bl2)
    b3 = jax.random.uniform(ks[5], (1, action_size), jnp.float32, -bl3, bl3)

    gamma = jnp.ones((1, h1), jnp.float32)
    beta = jnp.zeros((1, h1), jnp.float32)

    return dict(w1=w1, b1=b1, gamma=gamma, beta=beta,
                w2=w2, b2=b2, w3=w3, b3=b3)


def actor_reference(state, p):
    """Pure-JAX reference (faithful to the PyTorch forward, incl. b1)."""
    h1 = state @ p["w1"] + p["b1"]
    mean = jnp.mean(h1, axis=0, keepdims=True)
    var = jnp.mean((h1 - mean) ** 2, axis=0, keepdims=True)
    h1 = (h1 - mean) / jnp.sqrt(var + BN_EPS) * p["gamma"] + p["beta"]
    h1 = jnp.maximum(h1, 0.0)
    h2 = jnp.maximum(h1 @ p["w2"] + p["b2"], 0.0)
    return jnp.tanh(h2 @ p["w3"] + p["b3"])


if __name__ == "__main__":
    B = 40                 # not a multiple of the small tile -> exercises padding
    STATE_SIZE = 16
    ACTION_SIZE = 4
    ACTOR_UNITS = (32, 32)

    key = jax.random.PRNGKey(0)
    k_x, k_p = jax.random.split(key)

    state = jax.random.normal(k_x, (B, STATE_SIZE), jnp.float32)
    params = init_actor_params(k_p, STATE_SIZE, ACTION_SIZE, ACTOR_UNITS)

    ref = actor_reference(state, params)

    # Large-batch path (3 batch tiles of 16 rows + zero padding; stats + forward).
    out_tiled = jax.block_until_ready(actor_forward(state, params, tile_b=16))
    # Small-batch fused path (default big tile; whole batch in one grid step).
    out_fused = jax.block_until_ready(actor_forward(state, params))

    assert out_tiled.shape == (B, ACTION_SIZE)
    assert out_fused.shape == (B, ACTION_SIZE)
    assert jnp.allclose(out_tiled, ref, atol=1e-4, rtol=1e-4), (
        "tiled mismatch vs reference, max err "
        f"{jnp.max(jnp.abs(out_tiled - ref))}")
    assert jnp.allclose(out_fused, ref, atol=1e-4, rtol=1e-4), (
        "fused mismatch vs reference, max err "
        f"{jnp.max(jnp.abs(out_fused - ref))}")

    print("KERNEL_OK")
</pallas_src>

<mosaic_0001>
module attributes {stable_mosaic.version = 11 : i64} {
  func.func @actor_stats_kernel(%arg0: i32, %arg1: memref<1x1xf32, #tpu.memory_space<smem>>, %arg2: memref<16x16xf32, #tpu.memory_space<vmem>>, %arg3: memref<16x32xf32, #tpu.memory_space<vmem>>, %arg4: memref<2x32xf32, #tpu.memory_space<vmem>>, %arg5: memref<2x32xf32, #tpu.memory_space<vmem>>, %arg6: memref<1x32xf32, #tpu.memory_space<vmem>>, %arg7: memref<1x32xf32, #tpu.memory_space<vmem>>) attributes {dimension_semantics = [#tpu.dimension_semantics<arbitrary>], iteration_bounds = array<i64: 3>, scalar_prefetch = 0 : i64, scratch_operands = 2 : i64, tpu.core_type = #tpu.core_type<tc>, window_params = [{transform_indices = @transform_0, window_bounds = array<i64: 1, 1>}, {transform_indices = @transform_1, window_bounds = array<i64: 16, 16>}, {pipeline_mode = #tpu.pipeline_mode<synchronous>, transform_indices = @transform_2, window_bounds = array<i64: 16, 32>}, {pipeline_mode = #tpu.pipeline_mode<synchronous>, transform_indices = @transform_3, window_bounds = array<i64: 2, 32>}, {pipeline_mode = #tpu.pipeline_mode<synchronous>, transform_indices = @transform_4, window_bounds = array<i64: 2, 32>}]} {
    %c0_i32 = arith.constant 0 : i32
    %0 = arith.cmpi eq, %arg0, %c0_i32 : i32
    %1 = arith.extui %0 : i1 to i32
    %c0_i32_0 = arith.constant 0 : i32
    %2 = arith.cmpi ne, %1, %c0_i32_0 : i32
    scf.if %2 {
      %cst_15 = arith.constant 0.000000e+00 : f32
      %20 = vector.broadcast %cst_15 : f32 to vector<1x32xf32>
      %c0_16 = arith.constant 0 : index
      %c0_17 = arith.constant 0 : index
      %21 = vector.load %arg6[%c0_16, %c0_17] : memref<1x32xf32, #tpu.memory_space<vmem>>, vector<1x32xf32>
      tpu.vector_store %arg6[%c0_16, %c0_17], %20 {strides = array<i32>} : memref<1x32xf32, #tpu.memory_space<vmem>>, vector<1x32xf32>,
      %cst_18 = arith.constant 0.000000e+00 : f32
      %22 = vector.broadcast %cst_18 : f32 to vector<1x32xf32>
      %c0_19 = arith.constant 0 : index
      %c0_20 = arith.constant 0 : index
      %23 = vector.load %arg7[%c0_19, %c0_20] : memref<1x32xf32, #tpu.memory_space<vmem>>, vector<1x32xf32>
      tpu.vector_store %arg7[%c0_19, %c0_20], %22 {strides = array<i32>} : memref<1x32xf32, #tpu.memory_space<vmem>>, vector<1x32xf32>,
    } else {
    }
    %c0 = arith.constant 0 : index
    %c0_1 = arith.constant 0 : index
    %3 = vector.load %arg2[%c0, %c0_1] : memref<16x16xf32, #tpu.memory_space<vmem>>, vector<16x16xf32>
    %c0_2 = arith.constant 0 : index
    %c0_3 = arith.constant 0 : index
    %4 = vector.load %arg3[%c0_2, %c0_3] : memref<16x32xf32, #tpu.memory_space<vmem>>, vector<16x32xf32>
    %cst = arith.constant dense<0.000000e+00> : vector<16x32xf32>
    %5 = tpu.matmul %3, %4, %cst {dimension_numbers = #tpu.dot_dimension_numbers<[1], [0], [0], [1], [0, 0, 1, 1], [], []>} : vector<16x16xf32>, vector<16x32xf32>, vector<16x32xf32> -> vector<16x32xf32>
    %c0_4 = arith.constant 0 : index
    %c0_5 = arith.constant 0 : index
    %6 = vector.load %arg6[%c0_4, %c0_5] : memref<1x32xf32, #tpu.memory_space<vmem>>, vector<1x32xf32>
    %cst_6 = arith.constant dense<0.000000e+00> : vector<32xf32>
    %7 = vector.multi_reduction <add>, %5, %cst_6 [0] : vector<16x32xf32> to vector<32xf32>
    %8 = vector.shape_cast %7 : vector<32xf32> to vector<1x32xf32>
    %9 = arith.addf %6, %8 : vector<1x32xf32>
    %c0_7 = arith.constant 0 : index
    %c0_8 = arith.constant 0 : index
    %10 = vector.load %arg6[%c0_7, %c0_8] : memref<1x32xf32, #tpu.memory_space<vmem>>, vector<1x32xf32>
    tpu.vector_store %arg6[%c0_7, %c0_8], %9 {strides = array<i32>} : memref<1x32xf32, #tpu.memory_space<vmem>>, vector<1x32xf32>,
    %c0_9 = arith.constant 0 : index
    %c0_10 = arith.constant 0 : index
    %11 = vector.load %arg7[%c0_9, %c0_10] : memref<1x32xf32, #tpu.memory_space<vmem>>, vector<1x32xf32>
    %12 = arith.mulf %5, %5 : vector<16x32xf32>
    %cst_11 = arith.constant dense<0.000000e+00> : vector<32xf32>
    %13 = vector.multi_reduction <add>, %12, %cst_11 [0] : vector<16x32xf32> to vector<32xf32>
    %14 = vector.shape_cast %13 : vector<32xf32> to vector<1x32xf32>
    %15 = arith.addf %11, %14 : vector<1x32xf32>
    %c0_12 = arith.constant 0 : index
    %c0_13 = arith.constant 0 : index
    %16 = vector.load %arg7[%c0_12, %c0_13] : memref<1x32xf32, #tpu.memory_space<vmem>>, vector<1x32xf32>
    tpu.vector_store %arg7[%c0_12, %c0_13], %15 {strides = array<i32>} : memref<1x32xf32, #tpu.memory_space<vmem>>, vector<1x32xf32>,
    %c2_i32 = arith.constant 2 : i32
    %17 = arith.cmpi eq, %arg0, %c2_i32 : i32
    %18 = arith.extui %17 : i1 to i32
    %c0_i32_14 = arith.constant 0 : i32
    %19 = arith.cmpi ne, %18, %c0_i32_14 : i32
    scf.if %19 {
      %c0_15 = arith.constant 0 : index
      %c0_16 = arith.constant 0 : index
      %20 = memref.load %arg1[%c0_15, %c0_16] : memref<1x1xf32, #tpu.memory_space<smem>>
      %c0_17 = arith.constant 0 : index
      %c0_18 = arith.constant 0 : index
      %21 = vector.load %arg6[%c0_17, %c0_18] : memref<1x32xf32, #tpu.memory_space<vmem>>, vector<1x32xf32>
      %22 = vector.broadcast %20 : f32 to vector<1x32xf32>
      %23 = arith.mulf %21, %22 : vector<1x32xf32>
      %c0_19 = arith.constant 0 : index
      %c0_20 = arith.constant 0 : index
      %24 = vector.load %arg7[%c0_19, %c0_20] : memref<1x32xf32, #tpu.memory_space<vmem>>, vector<1x32xf32>
      %25 = vector.broadcast %20 : f32 to vector<1x32xf32>
      %26 = arith.mulf %24, %25 : vector<1x32xf32>
      %27 = arith.mulf %23, %23 : vector<1x32xf32>
      %28 = arith.subf %26, %27 : vector<1x32xf32>
      %cst_21 = arith.constant 0.000000e+00 : f32
      %29 = vector.broadcast %cst_21 : f32 to vector<1x32xf32>
      %30 = arith.maximumf %28, %29 : vector<1x32xf32>
      %c0_22 = arith.constant 0 : index
      %c0_23 = arith.constant 0 : index
      %31 = vector.load %arg4[%c0_22, %c0_23] : memref<2x32xf32, #tpu.memory_space<vmem>>, vector<1x32xf32>
      %cst_24 = arith.constant 9.99999974E-6 : f32
      %32 = vector.broadcast %cst_24 : f32 to vector<1x32xf32>
      %33 = arith.addf %30, %32 : vector<1x32xf32>
      %34 = math.rsqrt %33 : vector<1x32xf32>
      %35 = arith.mulf %31, %34 : vector<1x32xf32>
      %c0_25 = arith.constant 0 : index
      %c0_26 = arith.constant 0 : index
      %36 = vector.load %arg5[%c0_25, %c0_26] : memref<2x32xf32, #tpu.memory_space<vmem>>, vector<1x32xf32>
      tpu.vector_store %arg5[%c0_25, %c0_26], %35 {strides = array<i32>} : memref<2x32xf32, #tpu.memory_space<vmem>>, vector<1x32xf32>,
      %c1 = arith.constant 1 : index
      %c0_27 = arith.constant 0 : index
      %37 = vector.load %arg4[%c1, %c0_27] : memref<2x32xf32, #tpu.memory_space<vmem>>, vector<1x32xf32>
      %38 = arith.mulf %23, %35 : vector<1x32xf32>
      %39 = arith.subf %37, %38 : vector<1x32xf32>
      %c1_28 = arith.constant 1 : index
      %c0_29 = arith.constant 0 : index
      %40 = vector.load %arg5[%c1_28, %c0_29] : memref<2x32xf32, #tpu.memory_space<vmem>>, vector<1x32xf32>
      tpu.vector_store %arg5[%c1_28, %c0_29], %39 {strides = array<i32>} : memref<2x32xf32, #tpu.memory_space<vmem>>, vector<1x32xf32>,
    } else {
    }
    return
  }
  func.func @transform_0(%arg0: i32) -> (i32, i32) {
    %c0_i32 = arith.constant 0 : i32
    %c0_i32_0 = arith.constant 0 : i32
    %c0_i32_1 = arith.constant 0 : i32
    return %c0_i32, %c0_i32_0 : i32, i32
  }
  func.func @transform_1(%arg0: i32) -> (i32, i32) {
    %c0_i32 = arith.constant 0 : i32
    %c0_i32_0 = arith.constant 0 : i32
    return %arg0, %c0_i32 : i32, i32
  }
  func.func @transform_2(%arg0: i32) -> (i32, i32) {
    %c0_i32 = arith.constant 0 : i32
    %c0_i32_0 = arith.constant 0 : i32
    %c0_i32_1 = arith.constant 0 : i32
    return %c0_i32, %c0_i32_0 : i32, i32
  }
  func.func @transform_3(%arg0: i32) -> (i32, i32) {
    %c0_i32 = arith.constant 0 : i32
    %c0_i32_0 = arith.constant 0 : i32
    %c0_i32_1 = arith.constant 0 : i32
    return %c0_i32, %c0_i32_0 : i32, i32
  }
  func.func @transform_4(%arg0: i32) -> (i32, i32) {
    %c0_i32 = arith.constant 0 : i32
    %c0_i32_0 = arith.constant 0 : i32
    %c0_i32_1 = arith.constant 0 : i32
    return %c0_i32, %c0_i32_0 : i32, i32
  }
}

</mosaic_0001>

<bundles_post_ra>
// kernel: tpu_custom_call.1
= control target key start
LH: loop header
LB: loop body
LE: loop exit
PB: predicated region body
PF: predicated region fallthrough
CT: control target
= control target key end

     0   :  { %s549_s0 = inlined_call_operand.<no memory space> [shape: f32[1,1], index: 0, kind: input, shape index: {}]   ;;  %s550_s1 = inlined_call_operand.vmem [shape: f32[48,16], index: 1, kind: input, shape index: {}]   ;;  %s551_s2 = inlined_call_operand.vmem [shape: f32[16,32], index: 2, kind: input, shape index: {}]   ;;  %s552_s3 = inlined_call_operand.vmem [shape: f32[2,32], index: 3, kind: input, shape index: {}]   ;;  %s553_s4 = inlined_call_operand.hbm [shape: f32[2,32], index: 4, kind: output, shape index: {}]  }
   0x1   :  { %9 = sst [smem:[#allocation4]] %s549_s0 }
   0x2   :  { %10 = vsyncpa [#allocation6], 0  ;;  %s491_s17 = smov 0  }
   0x3 LB: > { %s497_s18 = sadd.s32 4294967295, %s459_s17   ;;  %p379_p0 = scmp.ge.s32.totalorder %s459_s17, 1  ;;  %s459_s17 = sphi %s491_s17, %s16_s17  }
   0x4   : > { %p160_p1 = scmp.lt.s32.totalorder %s459_s17, 4 }
   0x6   : > { %p161_p2 = pnand %p379_p0, %p160_p1 }
   0x7   : > { %s380_s19 = sshll.u32 (!%p161_p2), %s497_s18, 1  ;;  %p382_p4 = scmp.ne.s32.totalorder (!%p161_p2), %s497_s18, 0 }
   0x8   : > { %164 = sbr.rel (%p161_p2) target bundleno = 320 (0x140), region = 36  ;;  %p182_p3 = scmp.lt.s32.totalorder (!%p161_p2), %s380_s19, 5 }
   0xf   : > { %s555_s19 = smov (!%p182_p3, %s380_s19), 5  ;;  %190 = sbr.rel (%p382_p4) target bundleno = 22 (0x16), region = 40 }
  0x10   : > { %s381_s0 = sshll.u32 %s555_s19, 3  ;;  %vm191_vm0 = vcmask (!%p382_p4), 253952   ;;  %v461_v0 = vmov (!%p382_p4), 0.0  }
  0x11   : > { %s185_s22 = scalar_lea.vmem %s550_s1, %s381_s0  ;;  %192 = vst.msk [vmem:[#allocation2] sm:$0x1] (!%p382_p4), %vm191_vm0, %v461_v0  ;;  %193 = vst.msk [vmem:[#allocation3] sm:$0x1] (!%p382_p4), %vm191_vm0, %v461_v0 }
  0x16 PF: > { %v196_v1 = vld [vmem:[%s551_s2] sm:$0xff]  ;;  %v197_v2 = vld [vmem:[%s551_s2 + $0x8] sm:$0xff]  ;;  %vm198_vm1 = vcmask 130048   ;;  %vm281_vm2 = vcmask 261120   ;;  %vm292_vm3 = vcmask 253952   ;;  %p385_p5 = scmp.ne.s32.totalorder %s497_s18, 2 }
  0x17   : > { %v194_v3 = vld [vmem:[%s185_s22] sm:$0xff]  ;;  %v401_v4 = vpack.c.bf16 %v197_v2, %v196_v1  ;;  %v195_v5 = vld [vmem:[%s185_s22 + $0x8] sm:$0xff]  ;;  %s312_s27 = sld [smem:[#allocation4]] (!%p385_p5) }
  0x18   : > { %398 = vmatprep.mubr.msk.f32.mxu0 %vm198_vm1, %v194_v3  ;;  %v280_v25 = vld [vmem:[#allocation2] sm:$0x1]  ;;  %v294_v28 = vld [vmem:[#allocation3] sm:$0x1] }
  0x19   : > { %402 = vmatprep.subr.bf16.mxu0 %v401_v4  ;;  %v321_v41 = vld [vmem:[%s552_s3] sm:$0x1] (!%p385_p5)  ;;  %v326_v44 = vld [vmem:[%s552_s3 + $0x1] sm:$0x1] (!%p385_p5) }
  0x1a   : > { %404 = vmatpush3.bf16.msra.mxu0 %v401_v4 }
  0x1d   : > { %399 = vmatmul.mubr.msk.f32.vlgmr.msra.gmra.mrb[0].mxu0 %vm198_vm1, %v195_v5  ;;  %v314_v34 = vstv (!%p385_p5), %s312_s27 }
  0xf0   : > { %v400_v6 = vpop.f32.mrb[0].mxu0 }
  0xf1   : > { %v283_v7 = vsel %vm281_vm2, %v400_v6, 0.0  ;;  %v296_v8 = vmul.f32 %v400_v6, %v400_v6  ;;  %v271_v9 = vpop.f32.mrb[1].mxu0 }
  0xf2   : > { %v282_v10 = vsel %vm281_vm2, %v271_v9, 0.0  ;;  %v295_v11 = vmul.f32 %v271_v9, %v271_v9 }
  0xf3   : > { %v298_v12 = vsel %vm281_vm2, %v296_v8, 0.0  ;;  %v284_v13 = vadd.f32 %v283_v7, %v282_v10 }
  0xf4   : > { %v297_v14 = vsel %vm281_vm2, %v295_v11, 0.0 }
  0xf5   : > { %v285_v15 = vrot.slane %v284_v13, 4  ;;  %v299_v16 = vadd.f32 %v298_v12, %v297_v14 }
  0xf7   : > { %v286_v17 = vadd.f32 %v285_v15, %v284_v13  ;;  %v300_v18 = vrot.slane %v299_v16, 4 }
  0xf9   : > { %v287_v19 = vrot.slane %v286_v17, 2  ;;  %v301_v20 = vadd.f32 %v300_v18, %v299_v16 }
  0xfb   : > { %v288_v21 = vadd.f32 %v287_v19, %v286_v17  ;;  %v302_v22 = vrot.slane %v301_v20, 2 }
  0xfd   : > { %v289_v23 = vrot.slane %v288_v21, 1  ;;  %v303_v24 = vadd.f32 %v302_v22, %v301_v20 }
  0xff   : > { %v290_v26 = vadd.f32 %v289_v23, %v288_v21  ;;  %v304_v27 = vrot.slane %v303_v24, 1  ;;  %311 = sbr.rel (%p385_p5) target bundleno = 295 (0x127), region = 44 }
 0x101   : > { %v291_v29 = vadd.f32 %v290_v26, %v280_v25  ;;  %v305_v30 = vadd.f32 %v304_v27, %v303_v24 }
 0x103   : > { %293 = vst.msk [vmem:[#allocation2] sm:$0x1] %vm292_vm3, %v291_v29  ;;  %v306_v31 = vadd.f32 %v305_v30, %v294_v28 }
 0x105   : > { %307 = vst.msk [vmem:[#allocation3] sm:$0x1] %vm292_vm3, %v306_v31 }
 0x10a   : > { %v313_v32 = vld [vmem:[#allocation2] sm:$0x1] }
 0x10b   : > { %v315_v35 = vmul.f32 %v314_v34, %v313_v32 }
 0x10c   : > { %v316_v33 = vld [vmem:[#allocation3] sm:$0x1] }
 0x10d   : > { %v317_v36 = vmul.f32 %v316_v33, %v314_v34  ;;  %v318_v37 = vmul.f32 %v315_v35, %v315_v35 }
 0x10f   : > { %v319_v38 = vsub.f32 %v317_v36, %v318_v37 }
 0x111   : > { %v320_v39 = vmax.f32 %v319_v38, 0.0 }
 0x113   : > { %v322_v40 = vadd.f32 1e-05, %v320_v39 }
 0x115   : > { %421 = vrsqrt.f32 %v322_v40 }
 0x11f   : > { %v422_v42 = vpop.eup %421 }
 0x120   : > { %v324_v43 = vmul.f32 %v422_v42, %v321_v41 }
 0x122   : > { %325 = vst.msk [vmem:[#allocation5] sm:$0x1] %vm292_vm3, %v324_v43  ;;  %v327_v45 = vmul.f32 %v324_v43, %v315_v35 }
 0x124   : > { %v328_v46 = vsub.f32 %v326_v44, %v327_v45 }
 0x126   : > { %329 = vst.msk [vmem:[#allocation5 + $0x1] sm:$0x1] %vm292_vm3, %v328_v46 }
 0x127 PF: > { %p409_p6 = scmp.eq.s32.totalorder %s497_s18, 2  ;;  %s462_s6 = smov [#allocation5]  }
 0x128   : > { %s337_s7 = sshll.u32 %s462_s6, 4  ;;  %s338_s7 = int_to_ptr.vmem [resolvable:$true] %s337_s7 }
 0x129   : > { %s423_s8 = scalar_lea.vmem %s338_s7, 32  ;;  %p430_p10 = scmp.lt.s32.totalorder %s338_s7, %s338_s7 }
 0x12a   : > { %p424_p7 = scmp.ne.s32.totalorder %s338_s7, %s423_s8  ;;  %p431_p11 = scmp.lt.s32.totalorder %s423_s8, %s423_s8 }
 0x12c   : > { %p425_p8 = pnand %p424_p7, %p409_p6  ;;  %p432_p12 = por %p431_p11, %p430_p10 }
 0x12e   : > { %p426_p9 = pneg %p425_p8 }
 0x130   : > { %p433_p13 = pnand %p432_p12, %p426_p9 }
 0x132   : > { %436 = shalt.err (!%p433_p13)
}
 0x133   : > { %s437_s11 = scalar_lea.hbm %s553_s4, 32 }
 0x134   : > { %p438_p0 = scmp.ne.s32.totalorder %s553_s4, %s437_s11  ;;  %p443_p3 = scmp.lt.u32.totalorder %s437_s11, %s553_s4 }
 0x136   : > { %p439_p1 = pnand %p438_p0, %p409_p6 }
 0x138   : > { %p440_p2 = pneg %p439_p1 }
 0x13a   : > { %p445_p4 = pnand %p443_p3, %p440_p2 }
 0x13c   : > { %448 = shalt.err (!%p445_p4)
}
 0x13d   : > { %406 = dma.vmem_to_hbm [thread:$0]  (%p409_p6), %s338_s7, 32, %s553_s4, [#allocation6]  }
 0x13e   : > { %454 = dma.done.wait (%p409_p6), [#allocation6], 32  }
 0x13f   : > { %456 = vsyncadd (%p409_p6), [#allocation6], 4294967264 }
 0x140 PF: > { %s16_s17 = sadd.s32 1, %s459_s17  }
 0x141   : > { %p13_p5 = scmp.ge.s32.totalorder %s16_s17, 5  }
 0x143   :  { %15 = sbr.rel (!%p13_p5) target bundleno = 3 (0x3), region = 71 }
 0x14a   :  { %350 = vsyncpa [#allocation6], 1 }
 0x14b   :  { %352 = vsyncpa [#allocation6 + $0x1], 1 }

</bundles_post_ra>
